<compile_context>
chip_gen: v7x
topology: tpu7x:2x2x1
jax: 0.10.0
libtpu: 0.0.40
codegen_flags: <defaults>
</compile_context>

<pallas_src>
import jax
import jax.numpy as jnp
from jax.experimental import pallas as pl
from jax.experimental.pallas import tpu as pltpu


_TARGET_TILE_BYTES = 6 * 1024 * 1024   # per image tile (input or output)
_VMEM_LIMIT_BYTES = 48 * 1024 * 1024   # explicit scoped-VMEM limit (safe on v5e/v6e/v7x)


def _sublane_multiple(itemsize):
    # Packed-dtype sublane multiples: f32 -> 8, bf16 -> 16, int8/fp8 -> 32.
    return {4: 8, 2: 16, 1: 32}.get(itemsize, 8)


def _pick_tiles(R, L, itemsize):
    """Choose (tile_r, tile_l) so one tile stays near _TARGET_TILE_BYTES."""
    sublane = _sublane_multiple(itemsize)
    row_bytes = L * itemsize

    if row_bytes * min(sublane, R) <= _TARGET_TILE_BYTES or L <= 128:
        # Row-only tiling; lane axis stays full (full dim is always layout-legal).
        tile_l = L
        tile_r = max(1, _TARGET_TILE_BYTES // max(1, row_bytes))
        if tile_r >= R:
            tile_r = R
        else:
            tile_r = max(sublane, (tile_r // sublane) * sublane)
            # v7x megacore: prefer an even number of row steps so the
            # "parallel" axis load-balances across the two TensorCores.
            g = -(-R // tile_r)
            if g > 1 and g % 2 == 1:
                cand = -(-R // (g + 1))
                cand = -(-cand // sublane) * sublane
                if sublane <= cand < tile_r and (-(-R // cand)) % 2 == 0:
                    tile_r = cand
    else:
        # Rows are too big for a sublane-pack: keep `sublane` rows and tile the
        # lane axis in multiples of 128 (bounds VMEM for arbitrarily large H*W).
        tile_r = min(sublane, R)
        tile_l = (_TARGET_TILE_BYTES // (tile_r * itemsize)) // 128 * 128
        tile_l = max(128, min(tile_l, L))
    return tile_r, tile_l


def normalization(img, mean, std):
    """(img - mean[:, None, None]) / std[:, None, None] for NCHW `img`."""
    N, C, H, W = img.shape
    R = N * C
    L = H * W
    itemsize = jnp.dtype(img.dtype).itemsize

    # Fused multiply-add constants in float32: (x - mean)/std == x*(1/std) + (-mean/std).
    mean_f = jnp.asarray(mean, dtype=jnp.float32).reshape(-1)
    std_f = jnp.asarray(std, dtype=jnp.float32).reshape(-1)
    scale = 1.0 / std_f                      # (C,)
    bias = -mean_f * scale                   # (C,)

    tile_r, tile_l = _pick_tiles(R, L, itemsize)
    grid_r = pl.cdiv(R, tile_r)
    grid_l = pl.cdiv(L, tile_l)

    # VMEM-resident per-row constants (row r -> channel r % C). Pad to
    # grid_r * tile_r so the in-kernel dynamic slice on the tail row block
    # never reads out of bounds.
    R_pad = grid_r * tile_r
    scale_rows = jnp.tile(scale, N).reshape(R, 1)
    bias_rows = jnp.tile(bias, N).reshape(R, 1)
    if R_pad > R:
        zpad = jnp.zeros((R_pad - R, 1), jnp.float32)
        scale_rows = jnp.concatenate([scale_rows, zpad], axis=0)
        bias_rows = jnp.concatenate([bias_rows, zpad], axis=0)

    # Free contiguous reshape: row r of img2 is (n=r//C, c=r%C), lane axis = H*W.
    img2 = img.reshape(R, L)

    def kernel(scale_ref, bias_ref, img_ref, out_ref):
        # scale/bias are whole-array resident blocks; slice this step's rows.
        row0 = pl.multiple_of(pl.program_id(0) * tile_r, tile_r)
        s = scale_ref[pl.ds(row0, tile_r), :]        # (tile_r, 1) float32
        b = bias_ref[pl.ds(row0, tile_r), :]
        x = img_ref[...].astype(jnp.float32)
        out_ref[...] = (x * s + b).astype(out_ref.dtype)

    out2 = pl.pallas_call(
        kernel,
        out_shape=jax.ShapeDtypeStruct((R, L), img.dtype),
        grid=(grid_r, grid_l),
        in_specs=[
            # Constant index_map => Pallas keeps these resident (no re-DMA per step).
            pl.BlockSpec((R_pad, 1), lambda r, l: (0, 0)),   # scale
            pl.BlockSpec((R_pad, 1), lambda r, l: (0, 0)),   # bias
            pl.BlockSpec((tile_r, tile_l), lambda r, l: (r, l)),   # image tile
        ],
        out_specs=pl.BlockSpec((tile_r, tile_l), lambda r, l: (r, l)),
        compiler_params=pltpu.CompilerParams(
            dimension_semantics=("parallel", "parallel"),  # v7x: shard across 2 TCs
            vmem_limit_bytes=_VMEM_LIMIT_BYTES,
        ),
    )(scale_rows, bias_rows, img2)

    return out2.reshape(N, C, H, W)


if __name__ == "__main__":
    N, C, H, W = 2, 4, 16, 16

    key = jax.random.PRNGKey(0)
    img = jax.random.uniform(key, (N, C, H, W), dtype=jnp.float32)

    # Per-channel normalization constants (matches torch.tensor(mean).view(-1,1,1)).
    mean = jnp.array([0.485, 0.456, 0.406, 0.5], dtype=jnp.float32)
    std = jnp.array([0.229, 0.224, 0.225, 0.25], dtype=jnp.float32)

    out = normalization(img, mean, std)
    out = jax.block_until_ready(out)

    # Reference: plain JAX broadcast mirroring the PyTorch forward.
    ref = (img - mean[None, :, None, None]) / std[None, :, None, None]
    assert out.shape == img.shape
    assert jnp.allclose(out, ref, atol=1e-5, rtol=1e-5), float(
        jnp.max(jnp.abs(out - ref))
    )

    print("KERNEL_OK")
</pallas_src>

<mosaic_0001>
module attributes {stable_mosaic.version = 11 : i64} {
  func.func @kernel(%arg0: i32, %arg1: i32, %arg2: memref<8x1xf32, #tpu.memory_space<vmem>>, %arg3: memref<8x1xf32, #tpu.memory_space<vmem>>, %arg4: memref<8x256xf32, #tpu.memory_space<vmem>>, %arg5: memref<8x256xf32, #tpu.memory_space<vmem>>) attributes {dimension_semantics = [#tpu.dimension_semantics<parallel>, #tpu.dimension_semantics<parallel>], iteration_bounds = array<i64: 1, 1>, scalar_prefetch = 0 : i64, scratch_operands = 0 : i64, tpu.core_type = #tpu.core_type<tc>, window_params = [{pipeline_mode = #tpu.pipeline_mode<synchronous>, transform_indices = @transform_0, window_bounds = array<i64: 8, 1>}, {pipeline_mode = #tpu.pipeline_mode<synchronous>, transform_indices = @transform_1, window_bounds = array<i64: 8, 1>}, {transform_indices = @transform_2, window_bounds = array<i64: 8, 256>}, {transform_indices = @transform_3, window_bounds = array<i64: 8, 256>}]} {
    %c8_i32 = arith.constant 8 : i32
    %0 = arith.muli %arg0, %c8_i32 : i32
    %1 = tpu.assume_multiple %0, 8 : i32
    %2 = arith.index_cast %1 : i32 to index
    %c0 = arith.constant 0 : index
    %3 = vector.load %arg2[%2, %c0] : memref<8x1xf32, #tpu.memory_space<vmem>>, vector<8x1xf32>
    %4 = arith.index_cast %1 : i32 to index
    %c0_0 = arith.constant 0 : index
    %5 = vector.load %arg3[%4, %c0_0] : memref<8x1xf32, #tpu.memory_space<vmem>>, vector<8x1xf32>
    %c0_1 = arith.constant 0 : index
    %c0_2 = arith.constant 0 : index
    %6 = vector.load %arg4[%c0_1, %c0_2] : memref<8x256xf32, #tpu.memory_space<vmem>>, vector<8x256xf32>
    %7 = vector.broadcast %3 : vector<8x1xf32> to vector<8x256xf32>
    %8 = arith.mulf %6, %7 : vector<8x256xf32>
    %9 = vector.broadcast %5 : vector<8x1xf32> to vector<8x256xf32>
    %10 = arith.addf %8, %9 : vector<8x256xf32>
    %c0_3 = arith.constant 0 : index
    %c0_4 = arith.constant 0 : index
    %11 = vector.load %arg5[%c0_3, %c0_4] : memref<8x256xf32, #tpu.memory_space<vmem>>, vector<8x256xf32>
    tpu.vector_store %arg5[%c0_3, %c0_4], %10 {strides = array<i32>} : memref<8x256xf32, #tpu.memory_space<vmem>>, vector<8x256xf32>,
    return
  }
  func.func @transform_0(%arg0: i32, %arg1: i32) -> (i32, i32) {
    %c0_i32 = arith.constant 0 : i32
    %c0_i32_0 = arith.constant 0 : i32
    %c0_i32_1 = arith.constant 0 : i32
    return %c0_i32, %c0_i32_0 : i32, i32
  }
  func.func @transform_1(%arg0: i32, %arg1: i32) -> (i32, i32) {
    %c0_i32 = arith.constant 0 : i32
    %c0_i32_0 = arith.constant 0 : i32
    %c0_i32_1 = arith.constant 0 : i32
    return %c0_i32, %c0_i32_0 : i32, i32
  }
  func.func @transform_2(%arg0: i32, %arg1: i32) -> (i32, i32) {
    %c0_i32 = arith.constant 0 : i32
    return %arg0, %arg1 : i32, i32
  }
  func.func @transform_3(%arg0: i32, %arg1: i32) -> (i32, i32) {
    %c0_i32 = arith.constant 0 : i32
    return %arg0, %arg1 : i32, i32
  }
}

</mosaic_0001>

<bundles_post_ra>
// kernel: tpu_custom_call.1
= control target key start
LH: loop header
LB: loop body
LE: loop exit
PB: predicated region body
PF: predicated region fallthrough
CT: control target
= control target key end

     0   :  { %v79_v1 = vmov 0   ;;  %s125_s0 = inlined_call_operand.vmem [shape: f32[8,1], index: 0, kind: input, shape index: {}]   ;;  %s126_s1 = inlined_call_operand.vmem [shape: f32[8,1], index: 1, kind: input, shape index: {}]   ;;  %s127_s2 = inlined_call_operand.vmem [shape: f32[8,256], index: 2, kind: input, shape index: {}]   ;;  %s128_s3 = inlined_call_operand.hbm [shape: f32[8,256], index: 3, kind: output, shape index: {}]  }
   0x1   :  { %v17_v0 = vld [vmem:[%s125_s0] sm:$0xff]  ;;  %54 = vset.pattern.permute.xlu0 %v79_v1 }
   0x2   :  { %8 = vsyncpa [#allocation3], 0  ;;  %24 = vperm.xlu0 %54, %v17_v0   ;;  %v19_v2 = vld [vmem:[%s126_s1] sm:$0xff]  ;;  %v21_v4 = vld [vmem:[%s127_s2 + $0x8] sm:$0xff]  ;;  %s80_s20 = smov [#allocation2]  }
   0x3   :  { %v20_v3 = vld [vmem:[%s127_s2] sm:$0xff]  ;;  %s44_s0 = sshll.u32 %s80_s20, 4  ;;  %s45_s0 = int_to_ptr.vmem [resolvable:$true] %s44_s0 }
   0x4   :  { %s55_s1 = scalar_lea.vmem %s45_s0, 256  ;;  %p60_p1 = scmp.lt.s32.totalorder %s45_s0, %s45_s0 }
   0x5   :  { %p56_p0 = scmp.ne.s32.totalorder %s45_s0, %s55_s1  ;;  %p61_p2 = scmp.lt.s32.totalorder %s55_s1, %s55_s1 }
   0x6   :  { %31 = vperm.xlu0 %54, %v19_v2  }
   0x7   :  { %p62_p3 = por %p61_p2, %p60_p1 }
   0x9   :  { %p63_p4 = pnand %p62_p3, %p56_p0 }
  0x81   :  { %v25_v5 = vpop.permute.xlu0 %24 }
  0x82   :  { %v27_v6 = vmul.f32 %v25_v5, %v20_v3  ;;  %v28_v7 = vmul.f32 %v25_v5, %v21_v4 }
  0x85   :  { %v32_v8 = vpop.permute.xlu0 %31 }
  0x86   :  { %v34_v9 = vadd.f32 %v32_v8, %v27_v6  ;;  %v35_v10 = vadd.f32 %v32_v8, %v28_v7 }
  0x88   :  { %36 = vst [vmem:[#allocation2] sm:$0xff] %v34_v9  ;;  %37 = vst [vmem:[#allocation2 + $0x8] sm:$0xff] %v35_v10 }
  0x89   :  { %66 = shalt.err (!%p63_p4)
}
  0x8a   :  { %s67_s22 = scalar_lea.hbm %s128_s3, 256 }
  0x8b   :  { %p68_p5 = scmp.ne.s32.totalorder %s128_s3, %s67_s22  ;;  %p71_p6 = scmp.lt.u32.totalorder %s67_s22, %s128_s3 }
  0x8d   :  { %p73_p7 = pnand %p71_p6, %p68_p5 }
  0x8f   :  { %76 = shalt.err (!%p73_p7)
}
  0x90   :  { %47 = dma.vmem_to_hbm [thread:$0]  %s45_s0, 256, %s128_s3, [#allocation3]  }
  0x91   :  { %77 = dma.done.wait [#allocation3], 256  }
  0x92   :  { %78 = vsyncadd [#allocation3], 4294967040 }
  0x93   :  { %51 = vsyncpa [#allocation3], 1 }

</bundles_post_ra>
